<compile_context>
chip_gen: v6e
topology: v6e:2x2x1
jax: 0.10.0
libtpu: 0.0.40
codegen_flags: <defaults>
</compile_context>

<pallas_src>
import jax
import jax.numpy as jnp
from jax import lax
from jax.experimental import pallas as pl
from jax.experimental.pallas import tpu as pltpu

_SQRT_HALF = 0.7071067811865476  # 1/sqrt(2)


def _gelu_exact(x):
    # Exact GELU (matches torch.nn.GELU() default): 0.5*x*(1+erf(x/sqrt(2)))
    return 0.5 * x * (1.0 + lax.erf(x * _SQRT_HALF))


def _round_up(a, b):
    return ((a + b - 1) // b) * b


def _vmem_capacity_bytes():
    # Generation-aware VMEM capacity (128 MiB on v5e/v6e, 64 MiB per TC on v7x).
    try:
        cap = getattr(pltpu.get_tpu_info(), "vmem_capacity_bytes", None)
        if cap:
            return int(cap)
    except Exception:
        pass
    return 64 << 20  # conservative fallback (v7x per-TensorCore VMEM)


# ---------------------------------------------------------------------------
# Main kernel: C resident in VMEM, 1-D row-tiled grid over M.
# ---------------------------------------------------------------------------
def _asym_nonlin_kernel(x_ref, c_ref, o_ref):
    # GELU in f32 on the VPU -> MXU matmul in the native operand dtype with f32
    # accumulation -> GELU -> store in the output dtype.
    h = _gelu_exact(x_ref[...].astype(jnp.float32)).astype(c_ref.dtype)
    y = jnp.dot(h, c_ref[...], preferred_element_type=jnp.float32)
    o_ref[...] = _gelu_exact(y).astype(o_ref.dtype)


# ---------------------------------------------------------------------------
# Fallback kernel: 3-D grid (i, j, k) with K/N tiling and an f32 accumulator,
# used when C (x2 pipeline buffers) does not fit the VMEM budget.
# ---------------------------------------------------------------------------
def _asym_nonlin_tiled_kernel(x_ref, c_ref, o_ref, acc_ref):
    @pl.when(pl.program_id(2) == 0)
    def _():
        acc_ref[...] = jnp.zeros_like(acc_ref)

    h = _gelu_exact(x_ref[...].astype(jnp.float32)).astype(c_ref.dtype)
    acc_ref[...] += jnp.dot(h, c_ref[...], preferred_element_type=jnp.float32)

    @pl.when(pl.program_id(2) == pl.num_programs(2) - 1)
    def _():
        o_ref[...] = _gelu_exact(acc_ref[...]).astype(o_ref.dtype)


def _choose_tile_m(M, K, N, itemsize, budget, gran):
    """Largest MXU/dtype-aligned row tile whose true VMEM footprint fits.

    Footprint = C (resident, but still given two pipeline buffers by default)
              + double-buffered x / out tiles
              + f32 GELU & matmul intermediates of shape (tm, K) and (tm, N).
    Returns 0 when C alone does not fit (caller switches to the tiled kernel).
    """
    fixed = 2 * K * N * itemsize
    per_row = 2 * (K + N) * itemsize + 4 * (K + N)
    avail = budget - fixed
    if avail < per_row * gran:
        return 0
    tm = min(int(avail // per_row), 2048)
    if tm >= 512:
        tm = (tm // 256) * 256       # MXU-height aligned when budget allows
    elif tm >= 128:
        tm = (tm // 128) * 128
    else:
        tm = (tm // gran) * gran
    return max(tm, gran)


@jax.jit
def asym_nonlin(x, C):
    """y = GELU(GELU(x) @ C), matching the PyTorch AsymNonlin forward."""
    orig_shape = x.shape
    K = orig_shape[-1]
    assert C.shape[0] == K, "C first dim must match x last dim"
    N = C.shape[1]

    # Flatten leading dims into the row axis M (free: contiguous reshape).
    M = 1
    for d in orig_shape[:-1]:
        M *= d
    x2d = x.reshape(M, K)

    itemsize = jnp.dtype(x.dtype).itemsize
    gran = 16 if itemsize < 4 else 8           # bf16 vregs pack [16, 128]
    cap = _vmem_capacity_bytes()
    budget = int(cap * 0.7)

    tm = _choose_tile_m(M, K, N, itemsize, budget, gran)
    use_fallback = (tm == 0) or (tm < 64 and M >= 128)

    if not use_fallback:
        tm = min(tm, _round_up(M, gran))
        # Ensure >= 2 row blocks when there is enough work so both TensorCores
        # of a v7x chip are used (harmless extra grid step on single-TC chips).
        if M >= 256 and pl.cdiv(M, tm) < 2:
            tm = _round_up(pl.cdiv(M, 2), 128)
        grid_m = pl.cdiv(M, tm)

        need = ((2 * tm * K + 2 * tm * N + 2 * K * N) * itemsize
                + tm * (K + N) * 4 + (1 << 20))
        vmem_limit = int(min(max(need + need // 4, 4 << 20), int(cap * 0.9)))

        cost = pl.CostEstimate(
            flops=2 * M * K * N + 10 * M * (K + N),
            transcendentals=M * (K + N),
            bytes_accessed=itemsize * (M * K + K * N + M * N),
        )

        out2d = pl.pallas_call(
            _asym_nonlin_kernel,
            out_shape=jax.ShapeDtypeStruct((M, N), x.dtype),
            grid_spec=pltpu.PrefetchScalarGridSpec(
                num_scalar_prefetch=0,
                grid=(grid_m,),
                in_specs=[
                    pl.BlockSpec((tm, K), lambda i: (i, 0)),
                    pl.BlockSpec((K, N), lambda i: (0, 0)),   # VMEM-resident C
                ],
                out_specs=pl.BlockSpec((tm, N), lambda i: (i, 0)),
            ),
            compiler_params=pltpu.CompilerParams(
                dimension_semantics=("parallel",),
                vmem_limit_bytes=vmem_limit,
            ),
            cost_estimate=cost,
        )(x2d, C)
    else:
        # K/N-tiled fallback for large C.  K is the reduction axis, so both x
        # and C are zero-padded along K to a multiple of tk (GELU(0)=0, so the
        # padded columns contribute nothing).  M/N boundary blocks need no
        # padding: reads are padded and out-of-range writes are dropped.
        K_pad = _round_up(K, 128)
        tk = 128
        for cand in (512, 256):
            if K_pad % cand == 0:
                tk = cand
                break
        if K_pad != K:
            x2d = jnp.pad(x2d, ((0, 0), (0, K_pad - K)))
            C_k = jnp.pad(C, ((0, K_pad - K), (0, 0)))
        else:
            C_k = C

        tm_f = min(256, _round_up(M, gran))
        tn = min(512, _round_up(N, 128))

        need = ((2 * tm_f * tk + 2 * tk * tn + 2 * tm_f * tn) * itemsize
                + tm_f * tn * 4 + tm_f * tk * 4 + (1 << 20))
        vmem_limit = int(min(max(need + need // 4, 4 << 20), int(cap * 0.9)))

        cost = pl.CostEstimate(
            flops=2 * M * K_pad * N + 10 * M * (K + N),
            transcendentals=M * (K + N),
            bytes_accessed=itemsize * (M * K_pad + K_pad * N + M * N),
        )

        out2d = pl.pallas_call(
            _asym_nonlin_tiled_kernel,
            out_shape=jax.ShapeDtypeStruct((M, N), x.dtype),
            grid_spec=pltpu.PrefetchScalarGridSpec(
                num_scalar_prefetch=0,
                grid=(pl.cdiv(M, tm_f), pl.cdiv(N, tn), K_pad // tk),
                in_specs=[
                    pl.BlockSpec((tm_f, tk), lambda i, j, k: (i, k)),
                    pl.BlockSpec((tk, tn), lambda i, j, k: (k, j)),
                ],
                out_specs=pl.BlockSpec((tm_f, tn), lambda i, j, k: (i, j)),
                scratch_shapes=[pltpu.VMEM((tm_f, tn), jnp.float32)],
            ),
            compiler_params=pltpu.CompilerParams(
                dimension_semantics=("parallel", "parallel", "arbitrary"),
                vmem_limit_bytes=vmem_limit,
            ),
            cost_estimate=cost,
        )(x2d, C_k)

    return out2d.reshape(orig_shape[:-1] + (N,))


def _reference(x, C):
    # Pure-JAX reference for correctness checking.
    h = jax.nn.gelu(x.astype(jnp.float32), approximate=False)
    y = h @ C.astype(jnp.float32)
    return jax.nn.gelu(y, approximate=False).astype(x.dtype)


if __name__ == "__main__":
    key = jax.random.PRNGKey(0)
    kx, kc = jax.random.split(key)

    # Small shapes consistent with the module: x [batch=2, seq=8, hidden=32],
    # registered buffer C [32, 32] (square so the hidden dim is preserved).
    B, S, H = 2, 8, 32
    x = jax.random.normal(kx, (B, S, H), dtype=jnp.float32)
    C = jax.random.normal(kc, (H, H), dtype=jnp.float32) * 0.1

    out = asym_nonlin(x, C)
    out = jax.block_until_ready(out)

    ref = _reference(x, C)
    assert out.shape == (B, S, H)
    assert jnp.allclose(out, ref, atol=1e-5, rtol=1e-5), "mismatch vs reference"

    print("KERNEL_OK")
</pallas_src>

<mosaic_0001>
module attributes {stable_mosaic.version = 11 : i64} {
  func.func @_asym_nonlin_kernel(%arg0: i32, %arg1: memref<16x32xf32, #tpu.memory_space<vmem>>, %arg2: memref<32x32xf32, #tpu.memory_space<vmem>>, %arg3: memref<16x32xf32, #tpu.memory_space<vmem>>) attributes {dimension_semantics = [#tpu.dimension_semantics<parallel>], iteration_bounds = array<i64: 1>, scalar_prefetch = 0 : i64, scratch_operands = 0 : i64, tpu.core_type = #tpu.core_type<tc>, window_params = [{transform_indices = @transform_0, window_bounds = array<i64: 16, 32>}, {pipeline_mode = #tpu.pipeline_mode<synchronous>, transform_indices = @transform_1, window_bounds = array<i64: 32, 32>}, {transform_indices = @transform_2, window_bounds = array<i64: 16, 32>}]} {
    %c0 = arith.constant 0 : index
    %c0_0 = arith.constant 0 : index
    %0 = vector.load %arg1[%c0, %c0_0] : memref<16x32xf32, #tpu.memory_space<vmem>>, vector<16x32xf32>
    %cst = arith.constant 5.000000e-01 : f32
    %1 = vector.broadcast %cst : f32 to vector<16x32xf32>
    %2 = arith.mulf %1, %0 : vector<16x32xf32>
    %cst_1 = arith.constant 0.707106769 : f32
    %3 = vector.broadcast %cst_1 : f32 to vector<16x32xf32>
    %4 = arith.mulf %0, %3 : vector<16x32xf32>
    %5 = math.erf %4 : vector<16x32xf32>
    %cst_2 = arith.constant 1.000000e+00 : f32
    %6 = vector.broadcast %cst_2 : f32 to vector<16x32xf32>
    %7 = arith.addf %6, %5 : vector<16x32xf32>
    %8 = arith.mulf %2, %7 : vector<16x32xf32>
    %c0_3 = arith.constant 0 : index
    %c0_4 = arith.constant 0 : index
    %9 = vector.load %arg2[%c0_3, %c0_4] : memref<32x32xf32, #tpu.memory_space<vmem>>, vector<32x32xf32>
    %cst_5 = arith.constant dense<0.000000e+00> : vector<16x32xf32>
    %10 = tpu.matmul %8, %9, %cst_5 {dimension_numbers = #tpu.dot_dimension_numbers<[1], [0], [0], [1], [0, 0, 1, 1], [], []>} : vector<16x32xf32>, vector<32x32xf32>, vector<16x32xf32> -> vector<16x32xf32>
    %cst_6 = arith.constant 5.000000e-01 : f32
    %11 = vector.broadcast %cst_6 : f32 to vector<16x32xf32>
    %12 = arith.mulf %11, %10 : vector<16x32xf32>
    %cst_7 = arith.constant 0.707106769 : f32
    %13 = vector.broadcast %cst_7 : f32 to vector<16x32xf32>
    %14 = arith.mulf %10, %13 : vector<16x32xf32>
    %15 = math.erf %14 : vector<16x32xf32>
    %cst_8 = arith.constant 1.000000e+00 : f32
    %16 = vector.broadcast %cst_8 : f32 to vector<16x32xf32>
    %17 = arith.addf %16, %15 : vector<16x32xf32>
    %18 = arith.mulf %12, %17 : vector<16x32xf32>
    %c0_9 = arith.constant 0 : index
    %c0_10 = arith.constant 0 : index
    %19 = vector.load %arg3[%c0_9, %c0_10] : memref<16x32xf32, #tpu.memory_space<vmem>>, vector<16x32xf32>
    tpu.vector_store %arg3[%c0_9, %c0_10], %18 {strides = array<i32>} : memref<16x32xf32, #tpu.memory_space<vmem>>, vector<16x32xf32>,
    return
  }
  func.func @transform_0(%arg0: i32) -> (i32, i32) {
    %c0_i32 = arith.constant 0 : i32
    %c0_i32_0 = arith.constant 0 : i32
    return %arg0, %c0_i32 : i32, i32
  }
  func.func @transform_1(%arg0: i32) -> (i32, i32) {
    %c0_i32 = arith.constant 0 : i32
    %c0_i32_0 = arith.constant 0 : i32
    %c0_i32_1 = arith.constant 0 : i32
    return %c0_i32, %c0_i32_0 : i32, i32
  }
  func.func @transform_2(%arg0: i32) -> (i32, i32) {
    %c0_i32 = arith.constant 0 : i32
    %c0_i32_0 = arith.constant 0 : i32
    return %arg0, %c0_i32 : i32, i32
  }
}

</mosaic_0001>

<bundles_post_ra>
// kernel: asym_nonlin.1
= control target key start
LH: loop header
LB: loop body
LE: loop exit
PB: predicated region body
PF: predicated region fallthrough
CT: control target
= control target key end

     0   :  { %7 = vsyncpa [#allocation3], 0  ;;  %s308_s0 = inlined_call_operand.hbm [shape: f32[16,32], index: 0, kind: input, shape index: {}]   ;;  %s309_s1 = inlined_call_operand.hbm [shape: f32[32,32], index: 1, kind: input, shape index: {}]   ;;  %s310_s2 = inlined_call_operand.hbm [shape: f32[16,32], index: 2, kind: output, shape index: {}]  }
   0x1   :  { %8 = vsyncpa [#allocation6], 0 }
   0x2   :  { %9 = vsyncpa [#allocation4], 0  ;;  %s266_s9 = smov [#allocation2]  }
   0x3   :  { %s15_s10 = sshll.u32 %s266_s9, 4  ;;  %s16_s10 = int_to_ptr.vmem [resolvable:$true] %s15_s10 }
   0x4   :  { %s208_s11 = scalar_lea.vmem %s16_s10, 256  ;;  %p213_p1 = scmp.lt.s32.totalorder %s16_s10, %s16_s10 }
   0x5   :  { %p209_p0 = scmp.ne.s32.totalorder %s16_s10, %s208_s11  ;;  %p214_p2 = scmp.lt.s32.totalorder %s208_s11, %s208_s11 }
   0x7   :  { %p215_p3 = por %p214_p2, %p213_p1 }
   0x9   :  { %p216_p4 = pnand %p215_p3, %p209_p0 }
   0xb   :  { %219 = shalt.err (!%p216_p4)
}
   0xc   :  { %s267_s12 = smov 128   ;;  %s268_s13 = smov 8  }
   0xd   :  { %21 = dma.hbm_to_vmem [thread:$0]  %s308_s0, 256, %s16_s10, [#allocation3], %s267_s12, %s267_s12, %s268_s13  }
   0xe   :  { %s269_s16 = smov [#allocation5]  }
   0xf   :  { %s27_s17 = sshll.u32 %s269_s16, 4  ;;  %s28_s17 = int_to_ptr.vmem [resolvable:$true] %s27_s17 }
  0x10   :  { %s228_s18 = scalar_lea.vmem %s28_s17, 512  ;;  %p233_p6 = scmp.lt.s32.totalorder %s28_s17, %s28_s17 }
  0x11   :  { %p229_p5 = scmp.ne.s32.totalorder %s28_s17, %s228_s18  ;;  %p234_p7 = scmp.lt.s32.totalorder %s228_s18, %s228_s18 }
  0x13   :  { %p235_p8 = por %p234_p7, %p233_p6 }
  0x15   :  { %p236_p9 = pnand %p235_p8, %p229_p5 }
  0x17   :  { %239 = shalt.err (!%p236_p9)
}
  0x18   :  { %33 = dma.hbm_to_vmem [thread:$0]  %s309_s1, 512, %s28_s17, [#allocation6], %s267_s12, %s267_s12, %s268_s13  }
  0x19   :  { %260 = dma.done.wait [#allocation3], 256  }
  0x1a   :  { %261 = vsyncadd [#allocation3], 4294967040 }
  0x1b   :  { %262 = dma.done.wait [#allocation6], 512  }
  0x1c   :  { %263 = vsyncadd [#allocation6], 4294966784  ;;  %v55_v0 = vld [vmem:[#allocation5 + $0x18] sm:$0xff]  ;;  %v54_v1 = vld [vmem:[#allocation5 + $0x10] sm:$0xff]  ;;  %vm56_vm0 = vcmask 261120   ;;  %s270_s0 = smov [#allocation7]  }
  0x1d   :  { %176 = vmatprep.subr.mxu0 %v55_v0  ;;  %v40_v2 = vld [vmem:[#allocation2] sm:$0xff]  ;;  %v41_v3 = vld [vmem:[#allocation2 + $0x8] sm:$0xff]  ;;  %v53_v4 = vld [vmem:[#allocation5 + $0x8] sm:$0xff]  ;;  %s155_s1 = sshll.u32 %s270_s0, 4  ;;  %s156_s1 = int_to_ptr.vmem [resolvable:$true] %s155_s1 }
  0x1e   :  { %177 = vmatpush3.msra.mxu0 %v55_v0  ;;  %v44_v5 = vmul.f32 0.70710677, %v40_v2  ;;  %v45_v6 = vmul.f32 0.70710677, %v41_v3  ;;  %v52_v7 = vld [vmem:[#allocation5] sm:$0xff]  ;;  %v42_v8 = vmul.f32 0.5, %v40_v2  ;;  %p245_p11 = scmp.lt.s32.totalorder %s156_s1, %s156_s1 }
  0x1f   :  { %178 = vmatprep.subr.mxu0 %v54_v1  ;;  %v43_v10 = vmul.f32 0.5, %v41_v3  ;;  %s240_s21 = scalar_lea.vmem %s156_s1, 256 }
  0x20   :  { %179 = vmatpush3.msra.mxu0 %v54_v1  ;;  %192 = verf.f32 %v44_v5  ;;  %p241_p10 = scmp.ne.s32.totalorder %s156_s1, %s240_s21  ;;  %p246_p12 = scmp.lt.s32.totalorder %s240_s21, %s240_s21 }
  0x21   :  { %180 = vmatprep.subr.mxu0 %v53_v4  ;;  %194 = verf.f32 %v45_v6 }
  0x22   :  { %181 = vmatpush3.msra.mxu0 %v53_v4  ;;  %p247_p13 = por %p246_p12, %p245_p11 }
  0x23   :  { %182 = vmatprep.subr.mxu0 %v52_v7 }
  0x24   :  { %183 = vmatpush3.msra.mxu0 %v52_v7  ;;  %p248_p0 = pnand %p247_p13, %p241_p10 }
  0x2d   :  { %v193_v9 = vpop.eup %192 }
  0x2e   :  { %v195_v11 = vpop.eup %194  ;;  %v48_v12 = vadd.f32 1.0, %v193_v9 }
  0x2f   :  { %v49_v13 = vadd.f32 1.0, %v195_v11 }
  0x30   :  { %v50_v14 = vmul.f32 %v48_v12, %v42_v8 }
  0x31   :  { %v51_v15 = vmul.f32 %v49_v13, %v43_v10 }
  0x32   :  { %184 = vmatprep.mubr.msk.f32.mxu0 %vm56_vm0, %v50_v14 }
  0x33   :  { %185 = vmatmul.mubr.msk.f32.vlgmr.msra.gmra.mxu0 %vm56_vm0, %v51_v15 }
  0xf3   :  { %v186_v16 = vpop.f32.mrf.mxu0 }
  0xf4   :  { %v141_v17 = vmul.f32 0.70710677, %v186_v16  ;;  %v139_v21 = vmul.f32 0.5, %v186_v16 }
  0xf5   :  { %v129_v18 = vpop.f32.mrf.mxu0 }
  0xf6   :  { %196 = verf.f32 %v141_v17  ;;  %v140_v19 = vmul.f32 0.70710677, %v129_v18  ;;  %v138_v25 = vmul.f32 0.5, %v129_v18 }
  0xf8   :  { %198 = verf.f32 %v140_v19 }
 0x103   :  { %v197_v20 = vpop.eup %196 }
 0x104   :  { %v145_v22 = vadd.f32 1.0, %v197_v20 }
 0x105   :  { %v199_v23 = vpop.eup %198 }
 0x106   :  { %v147_v24 = vmul.f32 %v145_v22, %v139_v21  ;;  %v144_v26 = vadd.f32 1.0, %v199_v23 }
 0x108   :  { %149 = vst.msk [vmem:[#allocation7 + $0x8] sm:$0xff] %vm56_vm0, %v147_v24  ;;  %v146_v27 = vmul.f32 %v144_v26, %v138_v25 }
 0x10a   :  { %148 = vst.msk [vmem:[#allocation7] sm:$0xff] %vm56_vm0, %v146_v27 }
 0x10b   :  { %251 = shalt.err (!%p248_p0)
}
 0x10c   :  { %161 = dma.vmem_to_hbm [thread:$0]  %s156_s1, 256, %s310_s2, [#allocation4], %s267_s12, %s267_s12, %s268_s13  }
 0x10d   :  { %264 = dma.done.wait [#allocation4], 256  }
 0x10e   :  { %265 = vsyncadd [#allocation4], 4294967040 }
 0x10f   :  { %165 = vsyncpa [#allocation3], 1 }
 0x110   :  { %166 = vsyncpa [#allocation6], 1 }
 0x111   :  { %167 = vsyncpa [#allocation4], 1 }

</bundles_post_ra>
